<compile_context>
chip_gen: v7x
topology: tpu7x:2x2x1
jax: 0.10.0
libtpu: 0.0.40
codegen_flags: <defaults>
</compile_context>

<pallas_src>
import functools

import jax
import jax.numpy as jnp
from jax.experimental import pallas as pl
from jax.experimental.pallas import tpu as pltpu

ALPHA = 2.0
GAMMA = 2.0

_MAX_TILE_B = 32768                  # rows per batch tile (upper cap)


def _chip_config():
    """Generation-aware split count and VMEM budgets (safe defaults on error)."""
    kind = ""
    try:
        kind = jax.devices()[0].device_kind.lower()
    except Exception:  # pragma: no cover - defensive; keep defaults
        pass
    if "v7" in kind or "7x" in kind:
        # v7x: 2 TensorCores per chip, only 64 MiB VMEM per TC.
        return {"num_splits": 2, "vmem_budget": 28 << 20, "vmem_limit": 36 << 20}
    # v5e / v6e (and unknown): 1 TensorCore, 128 MiB physical VMEM.
    return {"num_splits": 1, "vmem_budget": 48 << 20, "vmem_limit": 64 << 20}


def _focal_loss_kernel(n_valid_ref, logits_ref, targets_ref, out_ref, acc_ref,
                       *, alpha, gamma, tile_b):
    s = pl.program_id(0)             # split (TensorCore) index
    i = pl.program_id(1)             # batch-tile index within the split
    n_inner = pl.num_programs(1)

    @pl.when(i == 0)
    def _():
        acc_ref[...] = jnp.zeros_like(acc_ref)

    x = logits_ref[...]                                      # (TB, C) input dtype
    t = targets_ref[...]                                     # (TB, 1) int32

    # Row max and one-hot select stay in the input dtype (bf16-native VPU on
    # v6e/v7x); exp/log/ce tail in f32. Identical math when inputs are f32.
    m = jnp.max(x, axis=-1, keepdims=True)                   # (TB, 1)
    ex = jnp.exp((x - m).astype(jnp.float32))                # (TB, C) f32
    lse = m.astype(jnp.float32) + jnp.log(
        jnp.sum(ex, axis=-1, keepdims=True))                 # (TB, 1) f32

    # Target-class logit via one-hot select (no lane gather). Iota is only
    # (1, C); broadcasting against t = (TB, 1) covers the sublane dim.
    col = jax.lax.broadcasted_iota(jnp.int32, (1, x.shape[-1]), 1)
    tgt = jnp.sum(jnp.where(col == t, x, jnp.zeros((), x.dtype)),
                  axis=-1, keepdims=True).astype(jnp.float32)

    ce = lse - tgt                                           # (TB, 1) f32
    pt = jnp.exp(-ce)
    u = 1.0 - pt
    if float(gamma) == 2.0:
        w = u * u                    # VPU squaring; avoids EUP pow
    else:
        w = jnp.power(jnp.maximum(u, 0.0), jnp.float32(gamma))
    focal = alpha * w * ce                                   # (TB, 1)

    n_valid = n_valid_ref[0]
    row0 = (s * n_inner + i) * tile_b
    straddles = row0 + tile_b > n_valid                      # tile has padded rows

    @pl.when(jnp.logical_not(straddles))
    def _():
        # Interior tile: no masking work at all.
        acc_ref[...] += jnp.sum(focal, axis=0, keepdims=True)

    @pl.when(straddles)
    def _():
        rows = row0 + jax.lax.broadcasted_iota(jnp.int32, (tile_b, 1), 0)
        masked = jnp.where(rows < n_valid, focal, 0.0)
        acc_ref[...] += jnp.sum(masked, axis=0, keepdims=True)

    @pl.when(i == n_inner - 1)
    def _():
        out_ref[...] = acc_ref[...][None]                    # (1, 1, 1)


def focal_loss(logits, targets, *, alpha=ALPHA, gamma=GAMMA):
    """logits: [N, C] float (f32/bf16); targets: [N] int class ids.

    Returns scalar mean focal loss, matching
        ce = F.cross_entropy(logits, targets, reduction='none')
        (alpha * (1 - exp(-ce)) ** gamma * ce).mean()
    """
    n, c = logits.shape
    targets2d = targets.astype(jnp.int32).reshape(n, 1)
    cfg = _chip_config()
    num_splits = int(cfg["num_splits"])

    itemsize = jnp.dtype(logits.dtype).itemsize

    # Per-row VMEM cost: 2x double-buffered logits+targets blocks plus an
    # allowance for f32 elementwise temporaries inside the block compute.
    per_row_vmem = 4 * (c * itemsize + 4) + 3 * c * 4
    tile_b = (int(cfg["vmem_budget"]) // per_row_vmem) // 8 * 8
    tile_b = max(8, min(_MAX_TILE_B, tile_b))
    rows_per_split = pl.cdiv(n, num_splits)
    tile_b = min(tile_b, max(8, ((rows_per_split + 7) // 8) * 8))

    n_inner = pl.cdiv(rows_per_split, tile_b)
    padded_n = num_splits * n_inner * tile_b
    if padded_n != n:
        pad = padded_n - n
        logits = jnp.pad(logits, ((0, pad), (0, 0)))
        targets2d = jnp.pad(targets2d, ((0, pad), (0, 0)))

    kernel = functools.partial(
        _focal_loss_kernel, alpha=float(alpha), gamma=float(gamma),
        tile_b=tile_b)

    cost = pl.CostEstimate(
        flops=int(8 * padded_n * c),
        transcendentals=int(padded_n * (c + 2)),
        bytes_accessed=int(padded_n * (c * itemsize + 4) + num_splits * 4),
    )

    partials = pl.pallas_call(
        kernel,
        out_shape=jax.ShapeDtypeStruct((num_splits, 1, 1), jnp.float32),
        grid_spec=pltpu.PrefetchScalarGridSpec(
            num_scalar_prefetch=1,
            grid=(num_splits, n_inner),
            in_specs=[
                pl.BlockSpec((tile_b, c), lambda s, i, nv: (s * n_inner + i, 0)),
                pl.BlockSpec((tile_b, 1), lambda s, i, nv: (s * n_inner + i, 0)),
            ],
            out_specs=pl.BlockSpec((1, 1, 1), lambda s, i, nv: (s, 0, 0)),
            scratch_shapes=[pltpu.VMEM((1, 1), jnp.float32)],
        ),
        compiler_params=pltpu.CompilerParams(
            dimension_semantics=(pltpu.PARALLEL, pltpu.ARBITRARY),
            vmem_limit_bytes=int(cfg["vmem_limit"])),
        cost_estimate=cost,
    )(jnp.array([n], dtype=jnp.int32), logits, targets2d)

    return jnp.sum(partials) / jnp.float32(n)


def focal_loss_ref(logits, targets, alpha=ALPHA, gamma=GAMMA):
    # Pure-JAX reference matching torch F.cross_entropy(..., reduction='none').
    logp = jax.nn.log_softmax(logits.astype(jnp.float32), axis=-1)
    ce = -jnp.take_along_axis(logp, targets[:, None], axis=-1)[:, 0]
    pt = jnp.exp(-ce)
    return jnp.mean(alpha * (1.0 - pt) ** gamma * ce)


if __name__ == "__main__":
    key = jax.random.PRNGKey(0)

    # Case 1: small, tile-aligned batch.
    k1, k2 = jax.random.split(key)
    N, C = 16, 32
    logits = jax.random.normal(k1, (N, C), dtype=jnp.float32)
    targets = jax.random.randint(k2, (N,), 0, C, dtype=jnp.int32)
    out = jax.block_until_ready(focal_loss(logits, targets))
    ref = focal_loss_ref(logits, targets)
    assert jnp.allclose(out, ref, rtol=1e-5, atol=1e-5), (out, ref)

    # Case 2: ragged batch (exercises padding + pl.when-guarded row masking).
    k3, k4 = jax.random.split(k1)
    N2, C2 = 23, 32
    logits2 = jax.random.normal(k3, (N2, C2), dtype=jnp.float32)
    targets2 = jax.random.randint(k4, (N2,), 0, C2, dtype=jnp.int32)
    out2 = jax.block_until_ready(focal_loss(logits2, targets2))
    ref2 = focal_loss_ref(logits2, targets2)
    assert jnp.allclose(out2, ref2, rtol=1e-5, atol=1e-5), (out2, ref2)

    print("KERNEL_OK")
</pallas_src>

<mosaic_0001>
module attributes {stable_mosaic.version = 11 : i64} {
  func.func @_focal_loss_kernel(%arg0: i32, %arg1: i32, %arg2: memref<1xi32, #tpu.memory_space<smem>>, %arg3: memref<16x32xf32, #tpu.memory_space<vmem>>, %arg4: memref<16x1xi32, #tpu.memory_space<vmem>>, %arg5: memref<1x1x1xf32, #tpu.memory_space<vmem>>, %arg6: memref<1x1xf32, #tpu.memory_space<vmem>>) attributes {dimension_semantics = [#tpu.dimension_semantics<parallel>, #tpu.dimension_semantics<arbitrary>], iteration_bounds = array<i64: 1, 1>, scalar_prefetch = 1 : i64, scratch_operands = 1 : i64, tpu.core_type = #tpu.core_type<tc>, window_params = [{transform_indices = @transform_0, window_bounds = array<i64: 16, 32>}, {transform_indices = @transform_1, window_bounds = array<i64: 16, 1>}, {transform_indices = @transform_2, window_bounds = array<i64: 1, 1, 1>}]} {
    %c0_i32 = arith.constant 0 : i32
    %0 = arith.cmpi eq, %arg1, %c0_i32 : i32
    %1 = arith.extui %0 : i1 to i32
    %c0_i32_0 = arith.constant 0 : i32
    %2 = arith.cmpi ne, %1, %c0_i32_0 : i32
    scf.if %2 {
      %cst_16 = arith.constant 0.000000e+00 : f32
      %46 = vector.broadcast %cst_16 : f32 to vector<1x1xf32>
      %c0_17 = arith.constant 0 : index
      %c0_18 = arith.constant 0 : index
      %47 = vector.load %arg6[%c0_17, %c0_18] : memref<1x1xf32, #tpu.memory_space<vmem>>, vector<1x1xf32>
      tpu.vector_store %arg6[%c0_17, %c0_18], %46 {strides = array<i32>} : memref<1x1xf32, #tpu.memory_space<vmem>>, vector<1x1xf32>,
    } else {
    }
    %c0 = arith.constant 0 : index
    %c0_1 = arith.constant 0 : index
    %3 = vector.load %arg3[%c0, %c0_1] : memref<16x32xf32, #tpu.memory_space<vmem>>, vector<16x32xf32>
    %c0_2 = arith.constant 0 : index
    %c0_3 = arith.constant 0 : index
    %4 = vector.load %arg4[%c0_2, %c0_3] : memref<16x1xi32, #tpu.memory_space<vmem>>, vector<16x1xi32>
    %cst = arith.constant dense<0xFF800000> : vector<16xf32>
    %5 = vector.multi_reduction <maximumf>, %3, %cst [1] : vector<16x32xf32> to vector<16xf32>
    %6 = vector.shape_cast %5 : vector<16xf32> to vector<16x1xf32>
    %7 = vector.broadcast %6 : vector<16x1xf32> to vector<16x32xf32>
    %8 = arith.subf %3, %7 : vector<16x32xf32>
    %9 = math.exp %8 : vector<16x32xf32>
    %cst_4 = arith.constant dense<0.000000e+00> : vector<16xf32>
    %10 = vector.multi_reduction <add>, %9, %cst_4 [1] : vector<16x32xf32> to vector<16xf32>
    %11 = vector.shape_cast %10 : vector<16xf32> to vector<16x1xf32>
    %12 = math.log %11 : vector<16x1xf32>
    %13 = arith.addf %6, %12 : vector<16x1xf32>
    %14 = tpu.iota {dimensions = array<i32: 1>} : vector<1x32xi32>
    %15 = vector.broadcast %14 : vector<1x32xi32> to vector<16x32xi32>
    %16 = vector.broadcast %4 : vector<16x1xi32> to vector<16x32xi32>
    %17 = arith.cmpi eq, %15, %16 : vector<16x32xi32>
    %cst_5 = arith.constant 0.000000e+00 : f32
    %18 = vector.broadcast %cst_5 : f32 to vector<16x32xf32>
    %19 = arith.select %17, %3, %18 : vector<16x32xi1>, vector<16x32xf32>
    %cst_6 = arith.constant dense<0.000000e+00> : vector<16xf32>
    %20 = vector.multi_reduction <add>, %19, %cst_6 [1] : vector<16x32xf32> to vector<16xf32>
    %21 = vector.shape_cast %20 : vector<16xf32> to vector<16x1xf32>
    %22 = arith.subf %13, %21 : vector<16x1xf32>
    %cst_7 = arith.constant 0.000000e+00 : f32
    %23 = vector.broadcast %cst_7 : f32 to vector<16x1xf32>
    %24 = arith.subf %23, %22 : vector<16x1xf32>
    %25 = math.exp %24 : vector<16x1xf32>
    %cst_8 = arith.constant 1.000000e+00 : f32
    %26 = vector.broadcast %cst_8 : f32 to vector<16x1xf32>
    %27 = arith.subf %26, %25 : vector<16x1xf32>
    %28 = arith.mulf %27, %27 : vector<16x1xf32>
    %cst_9 = arith.constant 2.000000e+00 : f32
    %29 = vector.broadcast %cst_9 : f32 to vector<16x1xf32>
    %30 = arith.mulf %29, %28 : vector<16x1xf32>
    %31 = arith.mulf %30, %22 : vector<16x1xf32>
    %c0_10 = arith.constant 0 : index
    %32 = memref.load %arg2[%c0_10] : memref<1xi32, #tpu.memory_space<smem>>
    %c1_i32 = arith.constant 1 : i32
    %33 = arith.muli %arg0, %c1_i32 : i32
    %34 = arith.addi %33, %arg1 : i32
    %c16_i32 = arith.constant 16 : i32
    %35 = arith.muli %34, %c16_i32 : i32
    %c16_i32_11 = arith.constant 16 : i32
    %36 = arith.addi %35, %c16_i32_11 : i32
    %37 = arith.cmpi sgt, %36, %32 : i32
    %true = arith.constant true
    %38 = arith.xori %37, %true : i1
    %39 = arith.extui %38 : i1 to i32
    %c0_i32_12 = arith.constant 0 : i32
    %40 = arith.cmpi ne, %39, %c0_i32_12 : i32
    scf.if %40 {
      %c0_16 = arith.constant 0 : index
      %c0_17 = arith.constant 0 : index
      %46 = vector.load %arg6[%c0_16, %c0_17] : memref<1x1xf32, #tpu.memory_space<vmem>>, vector<1x1xf32>
      %cst_18 = arith.constant dense<0.000000e+00> : vector<1xf32>
      %47 = vector.multi_reduction <add>, %31, %cst_18 [0] : vector<16x1xf32> to vector<1xf32>
      %48 = vector.shape_cast %47 : vector<1xf32> to vector<1x1xf32>
      %49 = arith.addf %46, %48 : vector<1x1xf32>
      %c0_19 = arith.constant 0 : index
      %c0_20 = arith.constant 0 : index
      %50 = vector.load %arg6[%c0_19, %c0_20] : memref<1x1xf32, #tpu.memory_space<vmem>>, vector<1x1xf32>
      tpu.vector_store %arg6[%c0_19, %c0_20], %49 {strides = array<i32>} : memref<1x1xf32, #tpu.memory_space<vmem>>, vector<1x1xf32>,
    } else {
    }
    %41 = arith.extui %37 : i1 to i32
    %c0_i32_13 = arith.constant 0 : i32
    %42 = arith.cmpi ne, %41, %c0_i32_13 : i32
    scf.if %42 {
      %46 = tpu.iota {dimensions = array<i32: 0>} : vector<16x1xi32>
      %47 = vector.broadcast %35 : i32 to vector<16x1xi32>
      %48 = arith.addi %47, %46 : vector<16x1xi32>
      %49 = vector.broadcast %32 : i32 to vector<16x1xi32>
      %50 = arith.cmpi slt, %48, %49 : vector<16x1xi32>
      %cst_16 = arith.constant 0.000000e+00 : f32
      %51 = vector.broadcast %cst_16 : f32 to vector<16x1xf32>
      %52 = arith.select %50, %31, %51 : vector<16x1xi1>, vector<16x1xf32>
      %c0_17 = arith.constant 0 : index
      %c0_18 = arith.constant 0 : index
      %53 = vector.load %arg6[%c0_17, %c0_18] : memref<1x1xf32, #tpu.memory_space<vmem>>, vector<1x1xf32>
      %cst_19 = arith.constant dense<0.000000e+00> : vector<1xf32>
      %54 = vector.multi_reduction <add>, %52, %cst_19 [0] : vector<16x1xf32> to vector<1xf32>
      %55 = vector.shape_cast %54 : vector<1xf32> to vector<1x1xf32>
      %56 = arith.addf %53, %55 : vector<1x1xf32>
      %c0_20 = arith.constant 0 : index
      %c0_21 = arith.constant 0 : index
      %57 = vector.load %arg6[%c0_20, %c0_21] : memref<1x1xf32, #tpu.memory_space<vmem>>, vector<1x1xf32>
      tpu.vector_store %arg6[%c0_20, %c0_21], %56 {strides = array<i32>} : memref<1x1xf32, #tpu.memory_space<vmem>>, vector<1x1xf32>,
    } else {
    }
    %c0_i32_14 = arith.constant 0 : i32
    %43 = arith.cmpi eq, %arg1, %c0_i32_14 : i32
    %44 = arith.extui %43 : i1 to i32
    %c0_i32_15 = arith.constant 0 : i32
    %45 = arith.cmpi ne, %44, %c0_i32_15 : i32
    scf.if %45 {
      %c0_16 = arith.constant 0 : index
      %c0_17 = arith.constant 0 : index
      %46 = vector.load %arg6[%c0_16, %c0_17] : memref<1x1xf32, #tpu.memory_space<vmem>>, vector<1x1xf32>
      %47 = vector.shape_cast %46 : vector<1x1xf32> to vector<1x1x1xf32>
      %c0_18 = arith.constant 0 : index
      %c0_19 = arith.constant 0 : index
      %c0_20 = arith.constant 0 : index
      %48 = vector.load %arg5[%c0_18, %c0_19, %c0_20] : memref<1x1x1xf32, #tpu.memory_space<vmem>>, vector<1x1x1xf32>
      tpu.vector_store %arg5[%c0_18, %c0_19, %c0_20], %47 {strides = array<i32>} : memref<1x1x1xf32, #tpu.memory_space<vmem>>, vector<1x1x1xf32>,
    } else {
    }
    return
  }
  func.func @transform_0(%arg0: i32, %arg1: i32, %arg2: memref<1xi32, #tpu.memory_space<smem>>) -> (i32, i32) {
    %c1_i32 = arith.constant 1 : i32
    %0 = arith.muli %arg0, %c1_i32 : i32
    %1 = arith.addi %0, %arg1 : i32
    %c0_i32 = arith.constant 0 : i32
    %c0_i32_0 = arith.constant 0 : i32
    return %1, %c0_i32 : i32, i32
  }
  func.func @transform_1(%arg0: i32, %arg1: i32, %arg2: memref<1xi32, #tpu.memory_space<smem>>) -> (i32, i32) {
    %c1_i32 = arith.constant 1 : i32
    %0 = arith.muli %arg0, %c1_i32 : i32
    %1 = arith.addi %0, %arg1 : i32
    %c0_i32 = arith.constant 0 : i32
    %c0_i32_0 = arith.constant 0 : i32
    return %1, %c0_i32 : i32, i32
  }
  func.func @transform_2(%arg0: i32, %arg1: i32, %arg2: memref<1xi32, #tpu.memory_space<smem>>) -> (i32, i32, i32) {
    %c0_i32 = arith.constant 0 : i32
    %c0_i32_0 = arith.constant 0 : i32
    %c0_i32_1 = arith.constant 0 : i32
    return %arg0, %c0_i32, %c0_i32_0 : i32, i32, i32
  }
}

</mosaic_0001>

<bundles_post_ra>
// kernel: tpu_custom_call.1
= control target key start
LH: loop header
LB: loop body
LE: loop exit
PB: predicated region body
PF: predicated region fallthrough
CT: control target
= control target key end

     0   :  { %9 = vsyncpa [#allocation6], 0  ;;  %s371_s0 = inlined_call_operand.<no memory space> [shape: s32[1], index: 0, kind: input, shape index: {}]   ;;  %s372_s1 = inlined_call_operand.hbm [shape: f32[16,32], index: 1, kind: input, shape index: {}]   ;;  %s373_s2 = inlined_call_operand.hbm [shape: s32[16,1], index: 2, kind: input, shape index: {}]   ;;  %s374_s3 = inlined_call_operand.hbm [shape: f32[1,1,1], index: 3, kind: output, shape index: {}]  }
   0x1   :  { %10 = vsyncpa [#allocation9], 0 }
   0x2   :  { %11 = vsyncpa [#allocation7], 0  ;;  %s287_s12 = smov [#allocation5]   ;;  %s215_s16 = scalar_lea.hbm %s372_s1, 256 }
   0x3   :  { %s21_s13 = sshll.u32 %s287_s12, 4  ;;  %p216_p0 = scmp.ne.s32.totalorder %s372_s1, %s215_s16  ;;  %s22_s13 = int_to_ptr.vmem [resolvable:$true] %s21_s13 }
   0x4   :  { %p219_p1 = scmp.lt.u32.totalorder %s215_s16, %s372_s1 }
   0x6   :  { %p221_p2 = pnand %p219_p1, %p216_p0 }
   0x8   :  { %224 = shalt.err (!%p221_p2)
}
   0x9   :  { %s225_s21 = scalar_lea.vmem %s22_s13, 256  ;;  %p230_p4 = scmp.lt.s32.totalorder %s22_s13, %s22_s13 }
   0xa   :  { %p226_p3 = scmp.ne.s32.totalorder %s22_s13, %s225_s21  ;;  %p231_p5 = scmp.lt.s32.totalorder %s225_s21, %s225_s21 }
   0xc   :  { %p232_p6 = por %p231_p5, %p230_p4 }
   0xe   :  { %p233_p7 = pnand %p232_p6, %p226_p3 }
  0x10   :  { %236 = shalt.err (!%p233_p7)
}
  0x11   :  { %s288_s22 = smov 128   ;;  %s289_s23 = smov 8  }
  0x12   :  { %27 = dma.hbm_to_vmem [thread:$0]  %s372_s1, 256, %s22_s13, [#allocation6], %s288_s22, %s288_s22, %s289_s23  }
  0x13   :  { %s290_s26 = smov [#allocation8]   ;;  %s237_s30 = scalar_lea.hbm %s373_s2, 256 }
  0x14   :  { %s37_s27 = sshll.u32 %s290_s26, 4  ;;  %p238_p8 = scmp.ne.s32.totalorder %s373_s2, %s237_s30  ;;  %s38_s27 = int_to_ptr.vmem [resolvable:$true] %s37_s27 }
  0x15   :  { %p241_p9 = scmp.lt.u32.totalorder %s237_s30, %s373_s2 }
  0x17   :  { %p243_p10 = pnand %p241_p9, %p238_p8 }
  0x19   :  { %246 = shalt.err (!%p243_p10)
}
  0x1a   :  { %s247_s8 = scalar_lea.vmem %s38_s27, 256  ;;  %p252_p12 = scmp.lt.s32.totalorder %s38_s27, %s38_s27 }
  0x1b   :  { %p248_p11 = scmp.ne.s32.totalorder %s38_s27, %s247_s8  ;;  %p253_p13 = scmp.lt.s32.totalorder %s247_s8, %s247_s8 }
  0x1d   :  { %p254_p0 = por %p253_p13, %p252_p12 }
  0x1f   :  { %p255_p1 = pnand %p254_p0, %p248_p11 }
  0x21   :  { %258 = shalt.err (!%p255_p1)
}
  0x22   :  { %43 = dma.hbm_to_vmem [thread:$0]  %s373_s2, 256, %s38_s27, [#allocation9], %s288_s22, %s288_s22, %s289_s23  }
  0x23   :  { %281 = dma.done.wait [#allocation6], 256  }
  0x24   :  { %282 = vsyncadd [#allocation6], 4294967040 }
  0x25   :  { %283 = dma.done.wait [#allocation9], 256  }
  0x26   :  { %284 = vsyncadd [#allocation9], 4294967040  ;;  %vm58_vm0 = vcmask 0   ;;  %v291_v0 = vmov 0.0   ;;  %v292_v1 = vmov 0   ;;  %vm64_vm1 = vcmask 261120  }
  0x27   :  { %59 = vst.msk [vmem:[#allocation2] sm:$0x1] %vm58_vm0, %v291_v0  ;;  %201 = vset.pattern.permute.xlu1 %v292_v1  ;;  %202 = vset.pattern.permute.xlu0 %v292_v1  ;;  %v60_v2 = vld [vmem:[#allocation5] sm:$0xff]  ;;  %v61_v3 = vld [vmem:[#allocation5 + $0x8] sm:$0xff]  ;;  %v62_v4 = vld [vmem:[#allocation8] sm:$0xff]  ;;  %v89_v12 = vlaneseq  ;;  %p192_p2 = scmp.lt.s32.totalorder %s371_s0, 16 }
  0x28   :  { %v65_v5 = vsel %vm64_vm1, %v60_v2, -inf  ;;  %92 = vperm.xlu1 %201, %v62_v4   ;;  %v63_v6 = vld [vmem:[#allocation8 + $0x8] sm:$0xff]  ;;  %v68_v7 = vsel %vm64_vm1, %v61_v3, -inf }
  0x29   :  { %66 = vmax.xlane.f32.xlu0 %v65_v5  ;;  %v90_v16 = vand.u32 127, %v89_v12 }
  0x2c   :  { %95 = vperm.xlu1 %201, %v63_v6  }
  0x2d   :  { %69 = vmax.xlane.f32.xlu0 %v68_v7 }
  0x2e   :  { %v132_v58 = vld [vmem:[#allocation2] sm:$0x1] (!%p192_p2) }
  0xa7   :  { %v93_v15 = vpop.permute.xlu1 %92 }
  0xa8   :  { %vm97_vm2 = vcmp.eq.s32.totalorder %v90_v16, %v93_v15 }
  0xa9   :  { %v99_v19 = vsel %vm97_vm2, %v60_v2, 0.0 }
  0xaa   :  { %v101_v21 = vsel %vm64_vm1, %v99_v19, 0.0 }
  0xab   :  { %v96_v17 = vpop.permute.xlu1 %95 }
  0xac   :  { %vm98_vm3 = vcmp.eq.s32.totalorder %v90_v16, %v96_v17 }
  0xad   :  { %v100_v23 = vsel %vm98_vm3, %v61_v3, 0.0 }
  0xae   :  { %v104_v25 = vsel %vm64_vm1, %v100_v23, 0.0 }
  0xb6   :  { %v67_v8 = vpop.xlane.xlu0 %66 }
  0xb7   :  { %v71_v9 = vsub.f32 %v60_v2, %v67_v8 }
  0xb9   :  { %v73_v10 = vmul.f32 1.442695, %v71_v9 }
  0xba   :  { %v70_v11 = vpop.xlane.xlu0 %69 }
  0xbb   :  { %203 = vpow2.f32 %v73_v10  ;;  %v72_v13 = vsub.f32 %v61_v3, %v70_v11 }
  0xbd   :  { %v75_v14 = vmul.f32 1.442695, %v72_v13 }
  0xbf   :  { %205 = vpow2.f32 %v75_v14 }
  0xc5   :  { %v204_v18 = vpop.eup %203 }
  0xc6   :  { %v77_v20 = vsel %vm64_vm1, %v204_v18, 0.0 }
  0xc7   :  { %78 = vadd.xlane.f32.xlu0 %v77_v20 }
  0xc9   :  { %v206_v22 = vpop.eup %205 }
  0xca   :  { %v80_v24 = vsel %vm64_vm1, %v206_v22, 0.0 }
  0xcb   :  { %81 = vadd.xlane.f32.xlu1 %v80_v24  ;;  %102 = vadd.xlane.f32.xlu0 %v101_v21 }
  0xcf   :  { %105 = vadd.xlane.f32.xlu0 %v104_v25 }
 0x154   :  { %v79_v26 = vpop.xlane.xlu0 %78 }
 0x155   :  { %207 = vlog2.f32 %v79_v26 }
 0x158   :  { %v82_v27 = vpop.xlane.xlu1 %81  ;;  %v103_v30 = vpop.xlane.xlu0 %102 }
 0x159   :  { %209 = vlog2.f32 %v82_v27 }
 0x15c   :  { %v106_v37 = vpop.xlane.xlu0 %105 }
 0x15f   :  { %v208_v28 = vpop.eup %207 }
 0x160   :  { %v84_v29 = vmul.f32 0.6931472, %v208_v28 }
 0x162   :  { %v87_v31 = vadd.f32 %v84_v29, %v67_v8 }
 0x163   :  { %v210_v32 = vpop.eup %209 }
 0x164   :  { %v86_v33 = vmul.f32 0.6931472, %v210_v32  ;;  %v107_v34 = vsub.f32 %v87_v31, %v103_v30 }
 0x166   :  { %v109_v35 = vsub.f32 0.0, %v107_v34  ;;  %v88_v36 = vadd.f32 %v86_v33, %v70_v11 }
 0x168   :  { %v111_v38 = vmul.f32 1.442695, %v109_v35  ;;  %v108_v39 = vsub.f32 %v88_v36, %v106_v37 }
 0x16a   :  { %211 = vpow2.f32 %v111_v38  ;;  %v110_v40 = vsub.f32 0.0, %v108_v39 }
 0x16c   :  { %v113_v41 = vmul.f32 1.442695, %v110_v40 }
 0x16e   :  { %213 = vpow2.f32 %v113_v41 }
 0x174   :  { %v212_v42 = vpop.eup %211 }
 0x175   :  { %v115_v43 = vsub.f32 1.0, %v212_v42 }
 0x177   :  { %v117_v44 = vmul.f32 %v115_v43, %v115_v43 }
 0x178   :  { %v214_v45 = vpop.eup %213 }
 0x179   :  { %v119_v46 = vmul.f32 2.0, %v117_v44  ;;  %v116_v47 = vsub.f32 1.0, %v214_v45  ;;  %131 = sbr.rel (%p192_p2) target bundleno = 402 (0x192), region = 25 }
 0x17b   :  { %v121_v48 = vmul.f32 %v119_v46, %v107_v34  ;;  %v118_v49 = vmul.f32 %v116_v47, %v116_v47 }
 0x17d   :  { %v120_v50 = vmul.f32 2.0, %v118_v49 }
 0x17f   :  { %v122_v51 = vmul.f32 %v120_v50, %v108_v39 }
 0x181   :  { %v133_v52 = vadd.f32 %v122_v51, %v121_v48 }
 0x183   :  { %v134_v53 = vrot.slane %v133_v52, 4 }
 0x185   :  { %v135_v54 = vadd.f32 %v134_v53, %v133_v52 }
 0x187   :  { %v136_v55 = vrot.slane %v135_v54, 2 }
 0x189   :  { %v137_v56 = vadd.f32 %v136_v55, %v135_v54 }
 0x18b   :  { %v138_v57 = vrot.slane %v137_v56, 1 }
 0x18d   :  { %v139_v59 = vadd.f32 %v138_v57, %v137_v56 }
 0x18f   :  { %v140_v60 = vadd.f32 %v139_v59, %v132_v58 }
 0x191   :  { %142 = vst.msk [vmem:[#allocation2] sm:$0x1] %vm58_vm0, %v140_v60 }
 0x192 PF:  { %p193_p3 = scmp.ge.s32.totalorder %s371_s0, 16 }
 0x193   :  { %v147_v61 = vshrl.u32 (!%p193_p3), %v89_v12, 7  ;;  %v152_v62 = vstv (!%p193_p3), %s371_s0 }
 0x194   :  { %145 = sbr.rel (%p193_p3) target bundleno = 426 (0x1aa), region = 29 }
 0x195   :  { %v148_v63 = vadd.s32 (!%p193_p3), 8, %v147_v61  ;;  %vm153_vm4 = vcmp.lt.s32.totalorder (!%p193_p3), %v147_v61, %v152_v62 }
 0x196   :  { %v155_v0 = vsel (!%p193_p3), %vm153_vm4, %v121_v48, 0.0 }
 0x197   :  { %vm154_vm5 = vcmp.lt.s32.totalorder (!%p193_p3), %v148_v63, %v152_v62 }
 0x198   :  { %v156_v1 = vsel (!%p193_p3), %vm154_vm5, %v122_v51, 0.0  ;;  %v157_v8 = vld [vmem:[#allocation2] sm:$0x1] (!%p193_p3) }
 0x199   :  { %v158_v2 = vadd.f32 (!%p193_p3), %v156_v1, %v155_v0 }
 0x19b   :  { %v159_v3 = vrot.slane %v158_v2, 4 }
 0x19d   :  { %v160_v4 = vadd.f32 %v159_v3, %v158_v2 }
 0x19f   :  { %v161_v5 = vrot.slane %v160_v4, 2 }
 0x1a1   :  { %v162_v6 = vadd.f32 %v161_v5, %v160_v4 }
 0x1a3   :  { %v163_v7 = vrot.slane %v162_v6, 1 }
 0x1a5   :  { %v164_v9 = vadd.f32 %v163_v7, %v162_v6 }
 0x1a7   :  { %v165_v10 = vadd.f32 %v164_v9, %v157_v8 }
 0x1a9   :  { %167 = vst.msk [vmem:[#allocation2] sm:$0x1] %vm58_vm0, %v165_v10 }
 0x1aa PF:  { %s293_s0 = smov [#allocation10]  }
 0x1ab   :  { %s180_s15 = sshll.u32 %s293_s0, 4  ;;  %s181_s15 = int_to_ptr.vmem [resolvable:$true] %s180_s15 }
 0x1ac   :  { %s259_s16 = scalar_lea.vmem %s181_s15, 16  ;;  %s263_s17 = scalar_lea.vmem %s181_s15, 32 }
 0x1ad   :  { %p260_p4 = scmp.ne.s32.totalorder %s181_s15, %s259_s16  ;;  %p264_p5 = scmp.lt.s32.totalorder %s181_s15, %s181_s15 }
 0x1ae   :  { %p265_p6 = scmp.lt.s32.totalorder %s263_s17, %s259_s16 }
 0x1b0   :  { %v171_v11 = vld [vmem:[#allocation2] sm:$0x1]  ;;  %p266_p7 = por %p265_p6, %p264_p5 }
 0x1b1   :  { %173 = vst.msk [vmem:[#allocation10] sm:$0x1] %vm58_vm0, %v171_v11 }
 0x1b2   :  { %p267_p8 = pnand %p266_p7, %p260_p4 }
 0x1b4   :  { %270 = shalt.err (!%p267_p8)
}
 0x1b5   :  { %s271_s20 = scalar_lea.hbm %s374_s3, 16 }
 0x1b6   :  { %p272_p9 = scmp.ne.s32.totalorder %s374_s3, %s271_s20  ;;  %p275_p10 = scmp.lt.u32.totalorder %s271_s20, %s374_s3 }
 0x1b8   :  { %p277_p11 = pnand %p275_p10, %p272_p9 }
 0x1ba   :  { %280 = shalt.err (!%p277_p11)
}
 0x1bb   :  { %183 = dma.vmem_to_hbm [thread:$0]  %s181_s15, 16, %s374_s3, [#allocation7]  }
 0x1bc   :  { %285 = dma.done.wait [#allocation7], 16  }
 0x1bd   :  { %286 = vsyncadd [#allocation7], 4294967280 }
 0x1be   :  { %187 = vsyncpa [#allocation6], 1 }
 0x1bf   :  { %188 = vsyncpa [#allocation9], 1 }
 0x1c0   :  { %189 = vsyncpa [#allocation7], 1 }

</bundles_post_ra>
